<compile_context>
chip_gen: v7x
topology: tpu7x:2x2x1
jax: 0.10.0
libtpu: 0.0.40
codegen_flags: <defaults>
</compile_context>

<pallas_src>
import math

import jax
import jax.numpy as jnp
from jax import lax
from jax.experimental import pallas as pl
from jax.experimental.pallas import tpu as pltpu


# --------------------------------------------------------------------------
# Chunk-size helpers
# --------------------------------------------------------------------------
def _largest_divisor_leq(n, target):
    t = max(1, min(n, int(target)))
    for c in range(t, 0, -1):
        if n % c == 0:
            return c
    return 1


def _pick_batch_chunk(bp, target):
    # bp is a multiple of 8; return the largest multiple of 8 dividing bp, <= target.
    t = max(8, min(bp, int(target)))
    t -= t % 8
    for c in range(t, 7, -8):
        if bp % c == 0:
            return c
    return 8


# --------------------------------------------------------------------------
# Kernel factory: one grid step = one (batch-chunk, time-chunk) tile
# --------------------------------------------------------------------------
def _make_lstm_kernel(Tc, Bc, H, GW, peephole, unroll):
    H2, H3, H4 = 2 * H, 3 * H, 4 * H

    def kernel(x_ref, u_ref, w_ref, b_ref, h0_ref, c0_ref,
               seq_ref, hN_ref, cN_ref, pre_sc, h_sc, c_sc):
        ti = pl.program_id(1)

        # ---- new batch chunk: load the initial recurrent state into the carry
        @pl.when(ti == 0)
        def _():
            h_sc[...] = h0_ref[...].astype(jnp.float32)
            c_sc[...] = c0_ref[...].astype(jnp.float32)

        # ---- chunk input projection: one dense MXU matmul, off the serial path
        pre = (jnp.dot(x_ref[...], u_ref[...],
                       preferred_element_type=jnp.float32)
               + b_ref[...])                                  # (Tc*Bc, 4H) f32
        pre_sc[...] = pre.astype(pre_sc.dtype)

        w = w_ref[...]                                        # (H, GW), loop invariant
        # TODO(synk): hold W in MXU weight registers across timesteps via
        # pltpu.matmul_push_rhs / matmul_acc_lhs instead of re-pushing it in
        # jnp.dot every iteration (and fold the bias add into the MRB on v7x).

        def step(t, carry):
            h, c = carry                                      # (Bc, H) f32
            ts = pl.multiple_of(t * Bc, Bc)                   # Bc % 8 == 0 -> aligned
            pre_t = pre_sc[pl.ds(ts, Bc), :].astype(jnp.float32)   # (Bc, 4H)
            if peephole:
                rec = jnp.dot(c.astype(w.dtype), w,
                              preferred_element_type=jnp.float32)  # (Bc, GW)
            else:
                rec = jnp.dot(h.astype(w.dtype), w,
                              preferred_element_type=jnp.float32)
            gl = pre_t[:, :GW] + rec
            sg = jax.nn.sigmoid(gl)                           # dense lane-slab EUP op
            i_t = sg[:, 0:H]
            f_t = sg[:, H:H2]
            o_t = sg[:, H2:H3]
            if peephole:
                # candidate = sigmoid((x @ U + b)[:, g])  (state independent)
                cand = jax.nn.sigmoid(pre_t[:, H3:H4])
                c_new = f_t * c + i_t * cand
                h_new = jnp.tanh(o_t * c_new)                 # quirky torch semantics
            else:
                g_t = jnp.tanh(gl[:, H3:H4])
                c_new = f_t * c + i_t * g_t
                h_new = o_t * jnp.tanh(c_new)
            seq_ref[pl.ds(ts, Bc), :] = h_new.astype(seq_ref.dtype)
            return h_new, c_new

        h_fin, c_fin = lax.fori_loop(0, Tc, step, (h_sc[...], c_sc[...]),
                                     unroll=unroll)
        h_sc[...] = h_fin
        c_sc[...] = c_fin

        @pl.when(ti == pl.num_programs(1) - 1)
        def _():
            hN_ref[...] = h_fin.astype(hN_ref.dtype)
            cN_ref[...] = c_fin.astype(cN_ref.dtype)

    return kernel


# --------------------------------------------------------------------------
# Wrapper
# --------------------------------------------------------------------------
def custom_lstm_peephole_forward(x, init_states, W, U, bias, *, peephole=True,
                                 time_chunk=32, batch_chunk=128,
                                 compute_dtype=jnp.float32):
    """x: (B, T, D) batch-first.  init_states = (h0, c0), each (B, H).

    Returns (hidden_seq (B, T, H), (h_T, c_T)) -- same as the torch module.
    compute_dtype: MXU operand / `pre` scratch dtype (bf16 recommended on v6e/v7x).
    """
    B, T, D = x.shape
    h0, c0 = init_states
    H = h0.shape[-1]
    if D != H:
        # torch module implicitly requires input_size == hidden_size (x_t @ U).
        raise ValueError("CustomLSTMPeephole requires input_size == hidden_size")

    out_dtype = x.dtype
    state_dtype = h0.dtype
    compute_dtype = jnp.dtype(compute_dtype)
    pre_dtype = jnp.float32 if compute_dtype == jnp.dtype(jnp.float32) else compute_dtype

    # ---- chunking ----------------------------------------------------------
    Bp = -(-B // 8) * 8                      # batch padded to 8-sublane multiple
    Bc = _pick_batch_chunk(Bp, batch_chunk)  # batch chunk (parallel grid axis)
    n_bc = Bp // Bc
    Tc = _largest_divisor_leq(T, time_chunk)
    n_tc = T // Tc
    unroll = Tc if Tc <= 8 else 8

    # ---- permute gate columns to [i, f, o, g]; optionally trim dead g from W
    def permute_cols(a):
        return jnp.concatenate([a[..., :2 * H], a[..., 3 * H:4 * H],
                                a[..., 2 * H:3 * H]], axis=-1)

    Up = permute_cols(U).astype(compute_dtype)
    bias_p = permute_cols(bias).reshape(1, 4 * H).astype(jnp.float32)
    Wp = permute_cols(W)
    trim = peephole and (3 * H) % 128 == 0   # keep 4H lane slab for small H
    GW = 3 * H if trim else 4 * H
    Wp = Wp[:, :GW].astype(compute_dtype)

    # ---- pad batch, lay rows out as (batch_chunk, t, batch_within_chunk) ----
    x_p = jnp.pad(x, ((0, Bp - B), (0, 0), (0, 0)))
    x_l = (x_p.reshape(n_bc, Bc, T, D).transpose(0, 2, 1, 3)
              .reshape(n_bc * T * Bc, D).astype(compute_dtype))
    h0_p = jnp.pad(h0, ((0, Bp - B), (0, 0)))
    c0_p = jnp.pad(c0, ((0, Bp - B), (0, 0)))

    kernel = _make_lstm_kernel(Tc, Bc, H, GW, peephole, unroll)

    # ---- VMEM budget for one grid step (streamed blocks double-buffered) ----
    isz = lambda dt: jnp.dtype(dt).itemsize
    est = (2 * Tc * Bc * D * isz(compute_dtype)        # x block (x2 buffers)
           + 2 * Tc * Bc * H * isz(out_dtype)          # seq block (x2 buffers)
           + Tc * Bc * 4 * H * isz(pre_dtype)          # pre scratch
           + D * 4 * H * isz(compute_dtype)            # U
           + H * GW * isz(compute_dtype)               # W
           + 4 * H * 4                                 # bias
           + 6 * Bc * H * 4)                           # h0/c0 blocks, carries, hN/cN
    vmem_limit = int(min(64 << 20, max(16 << 20, 2 * est + (1 << 20))))

    seq2d, h_n, c_n = pl.pallas_call(
        kernel,
        out_shape=(jax.ShapeDtypeStruct((n_bc * T * Bc, H), out_dtype),
                   jax.ShapeDtypeStruct((Bp, H), state_dtype),
                   jax.ShapeDtypeStruct((Bp, H), state_dtype)),
        grid_spec=pltpu.PrefetchScalarGridSpec(
            num_scalar_prefetch=0,
            grid=(n_bc, n_tc),
            in_specs=[
                pl.BlockSpec((Tc * Bc, D), lambda bi, ti: (bi * n_tc + ti, 0)),  # x
                pl.BlockSpec((D, 4 * H), lambda bi, ti: (0, 0)),                 # U
                pl.BlockSpec((H, GW), lambda bi, ti: (0, 0)),                    # W
                pl.BlockSpec((1, 4 * H), lambda bi, ti: (0, 0)),                 # bias
                pl.BlockSpec((Bc, H), lambda bi, ti: (bi, 0)),                   # h0
                pl.BlockSpec((Bc, H), lambda bi, ti: (bi, 0)),                   # c0
            ],
            out_specs=[
                pl.BlockSpec((Tc * Bc, H), lambda bi, ti: (bi * n_tc + ti, 0)),  # seq
                pl.BlockSpec((Bc, H), lambda bi, ti: (bi, 0)),                   # h_T
                pl.BlockSpec((Bc, H), lambda bi, ti: (bi, 0)),                   # c_T
            ],
            scratch_shapes=[pltpu.VMEM((Tc * Bc, 4 * H), pre_dtype),
                            pltpu.VMEM((Bc, H), jnp.float32),
                            pltpu.VMEM((Bc, H), jnp.float32)],
        ),
        compiler_params=pltpu.CompilerParams(
            dimension_semantics=("parallel", "arbitrary"),
            vmem_limit_bytes=vmem_limit),
    )(x_l, Up, Wp, bias_p, h0_p, c0_p)

    hidden_seq = (seq2d.reshape(n_bc, T, Bc, H).transpose(0, 2, 1, 3)
                  .reshape(Bp, T, H)[:B])                      # (B, T, H) batch-first
    return hidden_seq, (h_n[:B], c_n[:B])


# --------------------------------------------------------------------------
# Module wrapper with deterministic parameter initialization (as in torch)
# --------------------------------------------------------------------------
class CustomLSTMPeepholePallas:
    def __init__(self, input_size, hidden_size, key, peephole=True):
        self.input_sz = input_size
        self.hidden_size = hidden_size
        self.peephole = peephole
        stdv = 1.0 / math.sqrt(hidden_size)
        kw, ku, kb = jax.random.split(key, 3)
        self.W = jax.random.uniform(kw, (input_size, 4 * hidden_size),
                                    jnp.float32, -stdv, stdv)
        self.U = jax.random.uniform(ku, (hidden_size, 4 * hidden_size),
                                    jnp.float32, -stdv, stdv)
        self.bias = jax.random.uniform(kb, (4 * hidden_size,),
                                       jnp.float32, -stdv, stdv)

    def __call__(self, x, init_states, **kwargs):
        return custom_lstm_peephole_forward(
            x, init_states, self.W, self.U, self.bias,
            peephole=self.peephole, **kwargs)


# --------------------------------------------------------------------------
# Pure-JAX reference (mirrors the PyTorch forward exactly) for validation
# --------------------------------------------------------------------------
def _reference_forward(x, init_states, W, U, bias, peephole=True):
    B, T, D = x.shape
    h, c = init_states
    H = h.shape[-1]
    seq = []
    g = None
    for t in range(T):
        x_t = x[:, t, :]
        if peephole:
            gates = x_t @ U + c @ W + bias
        else:
            gates = x_t @ U + h @ W + bias
            g = jnp.tanh(gates[:, 2 * H:3 * H])
        i = jax.nn.sigmoid(gates[:, :H])
        f = jax.nn.sigmoid(gates[:, H:2 * H])
        o = jax.nn.sigmoid(gates[:, 3 * H:])
        if peephole:
            c = f * c + i * jax.nn.sigmoid(x_t @ U + bias)[:, 2 * H:3 * H]
            h = jnp.tanh(o * c)
        else:
            c = f * c + i * g
            h = o * jnp.tanh(c)
        seq.append(h[None])
    seq = jnp.concatenate(seq, axis=0)            # (T, B, H)
    return jnp.transpose(seq, (1, 0, 2)), (h, c)  # (B, T, H)


if __name__ == "__main__":
    key = jax.random.PRNGKey(0)
    B, T = 2, 8
    D = H = 32    # module requires input_size == hidden_size

    kp, kx, kh, kc = jax.random.split(key, 4)
    model = CustomLSTMPeepholePallas(input_size=D, hidden_size=H, key=kp,
                                     peephole=True)
    x = jax.random.normal(kx, (B, T, D), dtype=jnp.float32)
    h0 = 0.1 * jax.random.normal(kh, (B, H), dtype=jnp.float32)
    c0 = 0.1 * jax.random.normal(kc, (B, H), dtype=jnp.float32)

    ref_seq, (ref_h, ref_c) = _reference_forward(x, (h0, c0), model.W, model.U,
                                                 model.bias, peephole=True)

    # 1) f32 MXU operands (v5e-friendly path); time_chunk=4 -> grid=(1, 2) so the
    #    cross-chunk h/c carry is exercised.
    fwd32 = jax.jit(lambda xx, st: model(xx, st, time_chunk=4,
                                         compute_dtype=jnp.float32))
    seq32, (h32, c32) = fwd32(x, (h0, c0))
    jax.block_until_ready((seq32, h32, c32))
    assert seq32.shape == (B, T, H), seq32.shape
    assert h32.shape == (B, H) and c32.shape == (B, H)
    assert jnp.allclose(seq32, ref_seq, atol=2e-3, rtol=2e-3)
    assert jnp.allclose(h32, ref_h, atol=2e-3, rtol=2e-3)
    assert jnp.allclose(c32, ref_c, atol=2e-3, rtol=2e-3)

    # 2) bf16 MXU operands + bf16 pre scratch (v6e/v7x fast path), looser tolerance.
    fwd16 = jax.jit(lambda xx, st: model(xx, st, time_chunk=4,
                                         compute_dtype=jnp.bfloat16))
    seq16, (h16, c16) = fwd16(x, (h0, c0))
    jax.block_until_ready((seq16, h16, c16))
    assert jnp.allclose(seq16, ref_seq, atol=3e-2, rtol=3e-2)
    assert jnp.allclose(h16, ref_h, atol=3e-2, rtol=3e-2)
    assert jnp.allclose(c16, ref_c, atol=3e-2, rtol=3e-2)

    # 3) non-peephole branch (h-recurrence, tanh candidate from full gates).
    model_np = CustomLSTMPeepholePallas(input_size=D, hidden_size=H, key=kp,
                                        peephole=False)
    ref_seq2, (ref_h2, ref_c2) = _reference_forward(x, (h0, c0), model_np.W,
                                                    model_np.U, model_np.bias,
                                                    peephole=False)
    fwd_np = jax.jit(lambda xx, st: model_np(xx, st, time_chunk=4,
                                             compute_dtype=jnp.float32))
    seqn, (hn, cn) = fwd_np(x, (h0, c0))
    jax.block_until_ready((seqn, hn, cn))
    assert jnp.allclose(seqn, ref_seq2, atol=2e-3, rtol=2e-3)
    assert jnp.allclose(hn, ref_h2, atol=2e-3, rtol=2e-3)
    assert jnp.allclose(cn, ref_c2, atol=2e-3, rtol=2e-3)

    print("KERNEL_OK")
</pallas_src>

<mosaic_0001>
module attributes {stable_mosaic.version = 11 : i64} {
  func.func @kernel(%arg0: i32, %arg1: i32, %arg2: memref<32x32xf32, #tpu.memory_space<vmem>>, %arg3: memref<32x128xf32, #tpu.memory_space<vmem>>, %arg4: memref<32x128xf32, #tpu.memory_space<vmem>>, %arg5: memref<1x128xf32, #tpu.memory_space<vmem>>, %arg6: memref<8x32xf32, #tpu.memory_space<vmem>>, %arg7: memref<8x32xf32, #tpu.memory_space<vmem>>, %arg8: memref<32x32xf32, #tpu.memory_space<vmem>>, %arg9: memref<8x32xf32, #tpu.memory_space<vmem>>, %arg10: memref<8x32xf32, #tpu.memory_space<vmem>>, %arg11: memref<32x128xf32, #tpu.memory_space<vmem>>, %arg12: memref<8x32xf32, #tpu.memory_space<vmem>>, %arg13: memref<8x32xf32, #tpu.memory_space<vmem>>) attributes {dimension_semantics = [#tpu.dimension_semantics<parallel>, #tpu.dimension_semantics<arbitrary>], iteration_bounds = array<i64: 1, 2>, scalar_prefetch = 0 : i64, scratch_operands = 3 : i64, tpu.core_type = #tpu.core_type<tc>, window_params = [{transform_indices = @transform_0, window_bounds = array<i64: 32, 32>}, {pipeline_mode = #tpu.pipeline_mode<synchronous>, transform_indices = @transform_1, window_bounds = array<i64: 32, 128>}, {pipeline_mode = #tpu.pipeline_mode<synchronous>, transform_indices = @transform_2, window_bounds = array<i64: 32, 128>}, {pipeline_mode = #tpu.pipeline_mode<synchronous>, transform_indices = @transform_3, window_bounds = array<i64: 1, 128>}, {transform_indices = @transform_4, window_bounds = array<i64: 8, 32>}, {transform_indices = @transform_5, window_bounds = array<i64: 8, 32>}, {transform_indices = @transform_6, window_bounds = array<i64: 32, 32>}, {transform_indices = @transform_7, window_bounds = array<i64: 8, 32>}, {transform_indices = @transform_8, window_bounds = array<i64: 8, 32>}]} {
    %c0_i32 = arith.constant 0 : i32
    %0 = arith.cmpi eq, %arg1, %c0_i32 : i32
    %1 = arith.extui %0 : i1 to i32
    %c0_i32_0 = arith.constant 0 : i32
    %2 = arith.cmpi ne, %1, %c0_i32_0 : i32
    scf.if %2 {
      %c0_44 = arith.constant 0 : index
      %c0_45 = arith.constant 0 : index
      %126 = vector.load %arg6[%c0_44, %c0_45] : memref<8x32xf32, #tpu.memory_space<vmem>>, vector<8x32xf32>
      %c0_46 = arith.constant 0 : index
      %c0_47 = arith.constant 0 : index
      %127 = vector.load %arg12[%c0_46, %c0_47] : memref<8x32xf32, #tpu.memory_space<vmem>>, vector<8x32xf32>
      tpu.vector_store %arg12[%c0_46, %c0_47], %126 {strides = array<i32>} : memref<8x32xf32, #tpu.memory_space<vmem>>, vector<8x32xf32>,
      %c0_48 = arith.constant 0 : index
      %c0_49 = arith.constant 0 : index
      %128 = vector.load %arg7[%c0_48, %c0_49] : memref<8x32xf32, #tpu.memory_space<vmem>>, vector<8x32xf32>
      %c0_50 = arith.constant 0 : index
      %c0_51 = arith.constant 0 : index
      %129 = vector.load %arg13[%c0_50, %c0_51] : memref<8x32xf32, #tpu.memory_space<vmem>>, vector<8x32xf32>
      tpu.vector_store %arg13[%c0_50, %c0_51], %128 {strides = array<i32>} : memref<8x32xf32, #tpu.memory_space<vmem>>, vector<8x32xf32>,
    } else {
    }
    %c0 = arith.constant 0 : index
    %c0_1 = arith.constant 0 : index
    %3 = vector.load %arg2[%c0, %c0_1] : memref<32x32xf32, #tpu.memory_space<vmem>>, vector<32x32xf32>
    %c0_2 = arith.constant 0 : index
    %c0_3 = arith.constant 0 : index
    %4 = vector.load %arg3[%c0_2, %c0_3] : memref<32x128xf32, #tpu.memory_space<vmem>>, vector<32x128xf32>
    %cst = arith.constant dense<0.000000e+00> : vector<32x128xf32>
    %5 = tpu.matmul %3, %4, %cst {dimension_numbers = #tpu.dot_dimension_numbers<[1], [0], [0], [1], [0, 0, 1, 1], [], []>} : vector<32x32xf32>, vector<32x128xf32>, vector<32x128xf32> -> vector<32x128xf32>
    %c0_4 = arith.constant 0 : index
    %c0_5 = arith.constant 0 : index
    %6 = vector.load %arg5[%c0_4, %c0_5] : memref<1x128xf32, #tpu.memory_space<vmem>>, vector<1x128xf32>
    %7 = vector.broadcast %6 : vector<1x128xf32> to vector<32x128xf32>
    %8 = arith.addf %5, %7 : vector<32x128xf32>
    %c0_6 = arith.constant 0 : index
    %c0_7 = arith.constant 0 : index
    %9 = vector.load %arg11[%c0_6, %c0_7] : memref<32x128xf32, #tpu.memory_space<vmem>>, vector<32x128xf32>
    tpu.vector_store %arg11[%c0_6, %c0_7], %8 {strides = array<i32>} : memref<32x128xf32, #tpu.memory_space<vmem>>, vector<32x128xf32>,
    %c0_8 = arith.constant 0 : index
    %c0_9 = arith.constant 0 : index
    %10 = vector.load %arg4[%c0_8, %c0_9] : memref<32x128xf32, #tpu.memory_space<vmem>>, vector<32x128xf32>
    %c0_10 = arith.constant 0 : index
    %c0_11 = arith.constant 0 : index
    %11 = vector.load %arg12[%c0_10, %c0_11] : memref<8x32xf32, #tpu.memory_space<vmem>>, vector<8x32xf32>
    %c0_12 = arith.constant 0 : index
    %c0_13 = arith.constant 0 : index
    %12 = vector.load %arg13[%c0_12, %c0_13] : memref<8x32xf32, #tpu.memory_space<vmem>>, vector<8x32xf32>
    %c0_i32_14 = arith.constant 0 : i32
    %c8_i32 = arith.constant 8 : i32
    %13 = arith.muli %c0_i32_14, %c8_i32 : i32
    %14 = tpu.assume_multiple %13, 8 : i32
    %15 = arith.index_cast %14 : i32 to index
    %c0_15 = arith.constant 0 : index
    %16 = vector.load %arg11[%15, %c0_15] : memref<32x128xf32, #tpu.memory_space<vmem>>, vector<8x128xf32>
    %cst_16 = arith.constant dense<0.000000e+00> : vector<8x128xf32>
    %17 = tpu.matmul %12, %10, %cst_16 {dimension_numbers = #tpu.dot_dimension_numbers<[1], [0], [0], [1], [0, 0, 1, 1], [], []>} : vector<8x32xf32>, vector<32x128xf32>, vector<8x128xf32> -> vector<8x128xf32>
    %18 = arith.addf %16, %17 : vector<8x128xf32>
    %19 = arith.negf %18 : vector<8x128xf32>
    %20 = math.exp %19 : vector<8x128xf32>
    %cst_17 = arith.constant 1.000000e+00 : f32
    %21 = vector.broadcast %cst_17 : f32 to vector<8x128xf32>
    %22 = arith.addf %21, %20 : vector<8x128xf32>
    %23 = arith.divf %21, %22 : vector<8x128xf32>
    %24 = vector.extract_strided_slice %23 {offsets = [0, 0], sizes = [8, 32], strides = [1, 1]} : vector<8x128xf32> to vector<8x32xf32>
    %25 = vector.extract_strided_slice %23 {offsets = [0, 32], sizes = [8, 32], strides = [1, 1]} : vector<8x128xf32> to vector<8x32xf32>
    %26 = vector.extract_strided_slice %23 {offsets = [0, 64], sizes = [8, 32], strides = [1, 1]} : vector<8x128xf32> to vector<8x32xf32>
    %27 = vector.extract_strided_slice %16 {offsets = [0, 96], sizes = [8, 32], strides = [1, 1]} : vector<8x128xf32> to vector<8x32xf32>
    %28 = arith.negf %27 : vector<8x32xf32>
    %29 = math.exp %28 : vector<8x32xf32>
    %cst_18 = arith.constant 1.000000e+00 : f32
    %30 = vector.broadcast %cst_18 : f32 to vector<8x32xf32>
    %31 = arith.addf %30, %29 : vector<8x32xf32>
    %32 = arith.divf %30, %31 : vector<8x32xf32>
    %33 = arith.mulf %25, %12 : vector<8x32xf32>
    %34 = arith.mulf %24, %32 : vector<8x32xf32>
    %35 = arith.addf %33, %34 : vector<8x32xf32>
    %36 = arith.mulf %26, %35 : vector<8x32xf32>
    %37 = math.tanh %36 : vector<8x32xf32>
    %38 = arith.index_cast %14 : i32 to index
    %c0_19 = arith.constant 0 : index
    %39 = vector.load %arg8[%38, %c0_19] : memref<32x32xf32, #tpu.memory_space<vmem>>, vector<8x32xf32>
    tpu.vector_store %arg8[%38, %c0_19], %37 {strides = array<i32>} : memref<32x32xf32, #tpu.memory_space<vmem>>, vector<8x32xf32>,
    %c1_i32 = arith.constant 1 : i32
    %c8_i32_20 = arith.constant 8 : i32
    %40 = arith.muli %c1_i32, %c8_i32_20 : i32
    %41 = tpu.assume_multiple %40, 8 : i32
    %42 = arith.index_cast %41 : i32 to index
    %c0_21 = arith.constant 0 : index
    %43 = vector.load %arg11[%42, %c0_21] : memref<32x128xf32, #tpu.memory_space<vmem>>, vector<8x128xf32>
    %cst_22 = arith.constant dense<0.000000e+00> : vector<8x128xf32>
    %44 = tpu.matmul %35, %10, %cst_22 {dimension_numbers = #tpu.dot_dimension_numbers<[1], [0], [0], [1], [0, 0, 1, 1], [], []>} : vector<8x32xf32>, vector<32x128xf32>, vector<8x128xf32> -> vector<8x128xf32>
    %45 = arith.addf %43, %44 : vector<8x128xf32>
    %46 = arith.negf %45 : vector<8x128xf32>
    %47 = math.exp %46 : vector<8x128xf32>
    %cst_23 = arith.constant 1.000000e+00 : f32
    %48 = vector.broadcast %cst_23 : f32 to vector<8x128xf32>
    %49 = arith.addf %48, %47 : vector<8x128xf32>
    %50 = arith.divf %48, %49 : vector<8x128xf32>
    %51 = vector.extract_strided_slice %50 {offsets = [0, 0], sizes = [8, 32], strides = [1, 1]} : vector<8x128xf32> to vector<8x32xf32>
    %52 = vector.extract_strided_slice %50 {offsets = [0, 32], sizes = [8, 32], strides = [1, 1]} : vector<8x128xf32> to vector<8x32xf32>
    %53 = vector.extract_strided_slice %50 {offsets = [0, 64], sizes = [8, 32], strides = [1, 1]} : vector<8x128xf32> to vector<8x32xf32>
    %54 = vector.extract_strided_slice %43 {offsets = [0, 96], sizes = [8, 32], strides = [1, 1]} : vector<8x128xf32> to vector<8x32xf32>
    %55 = arith.negf %54 : vector<8x32xf32>
    %56 = math.exp %55 : vector<8x32xf32>
    %cst_24 = arith.constant 1.000000e+00 : f32
    %57 = vector.broadcast %cst_24 : f32 to vector<8x32xf32>
    %58 = arith.addf %57, %56 : vector<8x32xf32>
    %59 = arith.divf %57, %58 : vector<8x32xf32>
    %60 = arith.mulf %52, %35 : vector<8x32xf32>
    %61 = arith.mulf %51, %59 : vector<8x32xf32>
    %62 = arith.addf %60, %61 : vector<8x32xf32>
    %63 = arith.mulf %53, %62 : vector<8x32xf32>
    %64 = math.tanh %63 : vector<8x32xf32>
    %65 = arith.index_cast %41 : i32 to index
    %c0_25 = arith.constant 0 : index
    %66 = vector.load %arg8[%65, %c0_25] : memref<32x32xf32, #tpu.memory_space<vmem>>, vector<8x32xf32>
    tpu.vector_store %arg8[%65, %c0_25], %64 {strides = array<i32>} : memref<32x32xf32, #tpu.memory_space<vmem>>, vector<8x32xf32>,
    %c2_i32 = arith.constant 2 : i32
    %c8_i32_26 = arith.constant 8 : i32
    %67 = arith.muli %c2_i32, %c8_i32_26 : i32
    %68 = tpu.assume_multiple %67, 8 : i32
    %69 = arith.index_cast %68 : i32 to index
    %c0_27 = arith.constant 0 : index
    %70 = vector.load %arg11[%69, %c0_27] : memref<32x128xf32, #tpu.memory_space<vmem>>, vector<8x128xf32>
    %cst_28 = arith.constant dense<0.000000e+00> : vector<8x128xf32>
    %71 = tpu.matmul %62, %10, %cst_28 {dimension_numbers = #tpu.dot_dimension_numbers<[1], [0], [0], [1], [0, 0, 1, 1], [], []>} : vector<8x32xf32>, vector<32x128xf32>, vector<8x128xf32> -> vector<8x128xf32>
    %72 = arith.addf %70, %71 : vector<8x128xf32>
    %73 = arith.negf %72 : vector<8x128xf32>
    %74 = math.exp %73 : vector<8x128xf32>
    %cst_29 = arith.constant 1.000000e+00 : f32
    %75 = vector.broadcast %cst_29 : f32 to vector<8x128xf32>
    %76 = arith.addf %75, %74 : vector<8x128xf32>
    %77 = arith.divf %75, %76 : vector<8x128xf32>
    %78 = vector.extract_strided_slice %77 {offsets = [0, 0], sizes = [8, 32], strides = [1, 1]} : vector<8x128xf32> to vector<8x32xf32>
    %79 = vector.extract_strided_slice %77 {offsets = [0, 32], sizes = [8, 32], strides = [1, 1]} : vector<8x128xf32> to vector<8x32xf32>
    %80 = vector.extract_strided_slice %77 {offsets = [0, 64], sizes = [8, 32], strides = [1, 1]} : vector<8x128xf32> to vector<8x32xf32>
    %81 = vector.extract_strided_slice %70 {offsets = [0, 96], sizes = [8, 32], strides = [1, 1]} : vector<8x128xf32> to vector<8x32xf32>
    %82 = arith.negf %81 : vector<8x32xf32>
    %83 = math.exp %82 : vector<8x32xf32>
    %cst_30 = arith.constant 1.000000e+00 : f32
    %84 = vector.broadcast %cst_30 : f32 to vector<8x32xf32>
    %85 = arith.addf %84, %83 : vector<8x32xf32>
    %86 = arith.divf %84, %85 : vector<8x32xf32>
    %87 = arith.mulf %79, %62 : vector<8x32xf32>
    %88 = arith.mulf %78, %86 : vector<8x32xf32>
    %89 = arith.addf %87, %88 : vector<8x32xf32>
    %90 = arith.mulf %80, %89 : vector<8x32xf32>
    %91 = math.tanh %90 : vector<8x32xf32>
    %92 = arith.index_cast %68 : i32 to index
    %c0_31 = arith.constant 0 : index
    %93 = vector.load %arg8[%92, %c0_31] : memref<32x32xf32, #tpu.memory_space<vmem>>, vector<8x32xf32>
    tpu.vector_store %arg8[%92, %c0_31], %91 {strides = array<i32>} : memref<32x32xf32, #tpu.memory_space<vmem>>, vector<8x32xf32>,
    %c3_i32 = arith.constant 3 : i32
    %c8_i32_32 = arith.constant 8 : i32
    %94 = arith.muli %c3_i32, %c8_i32_32 : i32
    %95 = tpu.assume_multiple %94, 8 : i32
    %96 = arith.index_cast %95 : i32 to index
    %c0_33 = arith.constant 0 : index
    %97 = vector.load %arg11[%96, %c0_33] : memref<32x128xf32, #tpu.memory_space<vmem>>, vector<8x128xf32>
    %cst_34 = arith.constant dense<0.000000e+00> : vector<8x128xf32>
    %98 = tpu.matmul %89, %10, %cst_34 {dimension_numbers = #tpu.dot_dimension_numbers<[1], [0], [0], [1], [0, 0, 1, 1], [], []>} : vector<8x32xf32>, vector<32x128xf32>, vector<8x128xf32> -> vector<8x128xf32>
    %99 = arith.addf %97, %98 : vector<8x128xf32>
    %100 = arith.negf %99 : vector<8x128xf32>
    %101 = math.exp %100 : vector<8x128xf32>
    %cst_35 = arith.constant 1.000000e+00 : f32
    %102 = vector.broadcast %cst_35 : f32 to vector<8x128xf32>
    %103 = arith.addf %102, %101 : vector<8x128xf32>
    %104 = arith.divf %102, %103 : vector<8x128xf32>
    %105 = vector.extract_strided_slice %104 {offsets = [0, 0], sizes = [8, 32], strides = [1, 1]} : vector<8x128xf32> to vector<8x32xf32>
    %106 = vector.extract_strided_slice %104 {offsets = [0, 32], sizes = [8, 32], strides = [1, 1]} : vector<8x128xf32> to vector<8x32xf32>
    %107 = vector.extract_strided_slice %104 {offsets = [0, 64], sizes = [8, 32], strides = [1, 1]} : vector<8x128xf32> to vector<8x32xf32>
    %108 = vector.extract_strided_slice %97 {offsets = [0, 96], sizes = [8, 32], strides = [1, 1]} : vector<8x128xf32> to vector<8x32xf32>
    %109 = arith.negf %108 : vector<8x32xf32>
    %110 = math.exp %109 : vector<8x32xf32>
    %cst_36 = arith.constant 1.000000e+00 : f32
    %111 = vector.broadcast %cst_36 : f32 to vector<8x32xf32>
    %112 = arith.addf %111, %110 : vector<8x32xf32>
    %113 = arith.divf %111, %112 : vector<8x32xf32>
    %114 = arith.mulf %106, %89 : vector<8x32xf32>
    %115 = arith.mulf %105, %113 : vector<8x32xf32>
    %116 = arith.addf %114, %115 : vector<8x32xf32>
    %117 = arith.mulf %107, %116 : vector<8x32xf32>
    %118 = math.tanh %117 : vector<8x32xf32>
    %119 = arith.index_cast %95 : i32 to index
    %c0_37 = arith.constant 0 : index
    %120 = vector.load %arg8[%119, %c0_37] : memref<32x32xf32, #tpu.memory_space<vmem>>, vector<8x32xf32>
    tpu.vector_store %arg8[%119, %c0_37], %118 {strides = array<i32>} : memref<32x32xf32, #tpu.memory_space<vmem>>, vector<8x32xf32>,
    %c4_i32 = arith.constant 4 : i32
    %c0_38 = arith.constant 0 : index
    %c0_39 = arith.constant 0 : index
    %121 = vector.load %arg12[%c0_38, %c0_39] : memref<8x32xf32, #tpu.memory_space<vmem>>, vector<8x32xf32>
    tpu.vector_store %arg12[%c0_38, %c0_39], %118 {strides = array<i32>} : memref<8x32xf32, #tpu.memory_space<vmem>>, vector<8x32xf32>,
    %c0_40 = arith.constant 0 : index
    %c0_41 = arith.constant 0 : index
    %122 = vector.load %arg13[%c0_40, %c0_41] : memref<8x32xf32, #tpu.memory_space<vmem>>, vector<8x32xf32>
    tpu.vector_store %arg13[%c0_40, %c0_41], %116 {strides = array<i32>} : memref<8x32xf32, #tpu.memory_space<vmem>>, vector<8x32xf32>,
    %c1_i32_42 = arith.constant 1 : i32
    %123 = arith.cmpi eq, %arg1, %c1_i32_42 : i32
    %124 = arith.extui %123 : i1 to i32
    %c0_i32_43 = arith.constant 0 : i32
    %125 = arith.cmpi ne, %124, %c0_i32_43 : i32
    scf.if %125 {
      %c0_44 = arith.constant 0 : index
      %c0_45 = arith.constant 0 : index
      %126 = vector.load %arg9[%c0_44, %c0_45] : memref<8x32xf32, #tpu.memory_space<vmem>>, vector<8x32xf32>
      tpu.vector_store %arg9[%c0_44, %c0_45], %118 {strides = array<i32>} : memref<8x32xf32, #tpu.memory_space<vmem>>, vector<8x32xf32>,
      %c0_46 = arith.constant 0 : index
      %c0_47 = arith.constant 0 : index
      %127 = vector.load %arg10[%c0_46, %c0_47] : memref<8x32xf32, #tpu.memory_space<vmem>>, vector<8x32xf32>
      tpu.vector_store %arg10[%c0_46, %c0_47], %116 {strides = array<i32>} : memref<8x32xf32, #tpu.memory_space<vmem>>, vector<8x32xf32>,
    } else {
    }
    return
  }
  func.func @transform_0(%arg0: i32, %arg1: i32) -> (i32, i32) {
    %c2_i32 = arith.constant 2 : i32
    %0 = arith.muli %arg0, %c2_i32 : i32
    %1 = arith.addi %0, %arg1 : i32
    %c0_i32 = arith.constant 0 : i32
    %c0_i32_0 = arith.constant 0 : i32
    return %1, %c0_i32 : i32, i32
  }
  func.func @transform_1(%arg0: i32, %arg1: i32) -> (i32, i32) {
    %c0_i32 = arith.constant 0 : i32
    %c0_i32_0 = arith.constant 0 : i32
    %c0_i32_1 = arith.constant 0 : i32
    return %c0_i32, %c0_i32_0 : i32, i32
  }
  func.func @transform_2(%arg0: i32, %arg1: i32) -> (i32, i32) {
    %c0_i32 = arith.constant 0 : i32
    %c0_i32_0 = arith.constant 0 : i32
    %c0_i32_1 = arith.constant 0 : i32
    return %c0_i32, %c0_i32_0 : i32, i32
  }
  func.func @transform_3(%arg0: i32, %arg1: i32) -> (i32, i32) {
    %c0_i32 = arith.constant 0 : i32
    %c0_i32_0 = arith.constant 0 : i32
    %c0_i32_1 = arith.constant 0 : i32
    return %c0_i32, %c0_i32_0 : i32, i32
  }
  func.func @transform_4(%arg0: i32, %arg1: i32) -> (i32, i32) {
    %c0_i32 = arith.constant 0 : i32
    %c0_i32_0 = arith.constant 0 : i32
    return %arg0, %c0_i32 : i32, i32
  }
  func.func @transform_5(%arg0: i32, %arg1: i32) -> (i32, i32) {
    %c0_i32 = arith.constant 0 : i32
    %c0_i32_0 = arith.constant 0 : i32
    return %arg0, %c0_i32 : i32, i32
  }
  func.func @transform_6(%arg0: i32, %arg1: i32) -> (i32, i32) {
    %c2_i32 = arith.constant 2 : i32
    %0 = arith.muli %arg0, %c2_i32 : i32
    %1 = arith.addi %0, %arg1 : i32
    %c0_i32 = arith.constant 0 : i32
    %c0_i32_0 = arith.constant 0 : i32
    return %1, %c0_i32 : i32, i32
  }
  func.func @transform_7(%arg0: i32, %arg1: i32) -> (i32, i32) {
    %c0_i32 = arith.constant 0 : i32
    %c0_i32_0 = arith.constant 0 : i32
    return %arg0, %c0_i32 : i32, i32
  }
  func.func @transform_8(%arg0: i32, %arg1: i32) -> (i32, i32) {
    %c0_i32 = arith.constant 0 : i32
    %c0_i32_0 = arith.constant 0 : i32
    return %arg0, %c0_i32 : i32, i32
  }
}

</mosaic_0001>

<bundles_post_ra>
// kernel: _lambda_.1
= control target key start
LH: loop header
LB: loop body
LE: loop exit
PB: predicated region body
PF: predicated region fallthrough
CT: control target
= control target key end

     0   :  { %s1447_s27 = smov 0   ;;  %s1449_s28 = smov 0   ;;  %s1613_s0 = inlined_call_operand.vmem [shape: f32[64,32], index: 0, kind: input, shape index: {}]   ;;  %s1614_s1 = inlined_call_operand.vmem [shape: f32[32,128], index: 1, kind: input, shape index: {}]   ;;  %s1615_s2 = inlined_call_operand.vmem [shape: f32[32,128], index: 2, kind: input, shape index: {}]   ;;  %s1616_s3 = inlined_call_operand.vmem [shape: f32[1,128], index: 3, kind: input, shape index: {}]   ;;  %s1617_s4 = inlined_call_operand.vmem [shape: f32[8,32], index: 4, kind: input, shape index: {}]   ;;  %s1618_s5 = inlined_call_operand.vmem [shape: f32[8,32], index: 5, kind: input, shape index: {}]   ;;  %s1619_s6 = inlined_call_operand.vmem [shape: f32[64,32], index: 6, kind: output, shape index: {0}]   ;;  %s1620_s7 = inlined_call_operand.vmem [shape: f32[8,32], index: 7, kind: output, shape index: {1}]   ;;  %s1621_s8 = inlined_call_operand.vmem [shape: f32[8,32], index: 8, kind: output, shape index: {2}]  }
   0x1   :  { %s1451_s29 = smov 0  }
   0x2 LB: > { %s28_s4 = sadd.s32 1, %s1390_s28  ;;  %p1153_p0 = scmp.ge.s32.totalorder %s1394_s29, 1  ;;  %s1394_s29 = sphi %s1451_s29, %s19_s29   ;;  %s1390_s28 = sphi %s1449_s28, %s1623_s28   ;;  %s1386_s27 = sphi %s1447_s27, %s1622_s27  }
   0x3   : > { %p29_p1 = scmp.ge.s32.totalorder %s28_s4, 2  ;;  %p310_p2 = scmp.lt.s32.totalorder %s1394_s29, 3 }
   0x5   : > { %s1625_s4 = smov (%p29_p1, %s28_s4), 0  ;;  %p311_p3 = pnand %p1153_p0, %p310_p2 }
   0x6   : > { %s1154_s30 = sshll.u32 (!%p311_p3), %s1386_s27, 2  ;;  %p1158_p5 = scmp.ne.s32.totalorder (!%p311_p3), %s1386_s27, 0 }
   0x7   : > { %314 = sbr.rel (%p311_p3) target bundleno = 2173 (0x87d), region = 44  ;;  %p367_p4 = scmp.lt.s32.totalorder (!%p311_p3), %s1154_s30, 7 }
   0xe   : > { %s1627_s30 = smov (!%p367_p4, %s1154_s30), 7  ;;  %403 = sbr.rel (%p1158_p5) target bundleno = 21 (0x15), region = 48 }
   0xf   : > { %s1155_s9 = sshll.u32 %s1627_s30, 3  ;;  %vm405_vm0 = vcmask (!%p1158_p5), 261120   ;;  %v407_v0 = vld [vmem:[%s1618_s5] sm:$0xff] (!%p1158_p5) }
  0x10   : > { %s1471_s12 = scalar_lea.vmem %s1613_s0, %s1155_s9  ;;  %s1476_s15 = scalar_lea.vmem %s1619_s6, %s1155_s9  ;;  %408 = vst.msk [vmem:[#allocation4] sm:$0xff] (!%p1158_p5), %vm405_vm0, %v407_v0 }
  0x15 PF: > { %v413_v1 = vld [vmem:[%s1614_s1] sm:$0xff]  ;;  %v414_v2 = vld [vmem:[%s1614_s1 + $0x8] sm:$0xff]  ;;  %v415_v3 = vld [vmem:[%s1614_s1 + $0x10] sm:$0xff]  ;;  %vm424_vm1 = vcmask 261120   ;;  %v1396_v5 = vmov 0.0|0.0   ;;  %vm1397_vm2 = vmmov 0  }
  0x16   : > { %v1270_v4 = vpack.c.bf16 %v414_v2, %v413_v1  ;;  %1278 = vmatprep.subr.bf16.mxu1 %v1396_v5  ;;  %v416_v6 = vld [vmem:[%s1614_s1 + $0x18] sm:$0xff]  ;;  %v526_v7 = vld [vmem:[%s1615_s2] sm:$0xff]  ;;  %v527_v8 = vld [vmem:[%s1615_s2 + $0x8] sm:$0xff]  ;;  %v1398_v13 = vmov 0.0   ;;  %s1399_s19 = smov 32   ;;  %s1401_s20 = smov 64  }
  0x17   : > { %v1274_v9 = vpack.c.bf16 %v416_v6, %v415_v3  ;;  %v1501_v10 = vpack.c.bf16 %v527_v8, %v526_v7  ;;  %v409_v11 = vld [vmem:[%s1471_s12] sm:$0xff]  ;;  %v528_v12 = vld [vmem:[%s1615_s2 + $0x10] sm:$0xff]  ;;  %1234 = vmatprep.mubr.msk.f32.mxu1 %vm1397_vm2, %v1398_v13  ;;  %v529_v14 = vld [vmem:[%s1615_s2 + $0x18] sm:$0xff]  ;;  %p1179_p6 = scmp.ne.s32.totalorder %s1386_s27, 1 }
  0x18   : > { %1271 = vmatprep.subr.bf16.mxu0 %v1270_v4  ;;  %1220 = vmatprep.mubr.msk.f32.mxu0 %vm424_vm1, %v409_v11  ;;  %v1514_v15 = vpack.c.bf16 %v529_v14, %v528_v12  ;;  %v410_v16 = vld [vmem:[%s1471_s12 + $0x8] sm:$0xff]  ;;  %v530_v17 = vld [vmem:[#allocation4] sm:$0xff]  ;;  %v411_v37 = vld [vmem:[%s1471_s12 + $0x10] sm:$0xff] }
  0x19   : > { %1273 = vmatpush3.bf16.msra.mxu0 %v1270_v4  ;;  %1280 = vmatpush3.bf16.msra.mxu1 %v1501_v10  ;;  %v1535_v18 = vld [vmem:[%s1616_s3] ss:$0 sm:$0xff]  ;;  %v412_v38 = vld [vmem:[%s1471_s12 + $0x18] sm:$0xff]  ;;  %s1400_s12 = smov 96  }
  0x1a   : > { %1275 = vmatprep.subr.bf16.mxu0 %v1274_v9  ;;  %1281 = vmatprep.subr.bf16.mxu1 %v1396_v5 }
  0x1d   : > { %1277 = vmatpush3.bf16.msra.mxu0 %v1274_v9  ;;  %1283 = vmatpush3.bf16.msra.mxu1 %v1514_v15 }
  0x1e   : > { %1284 = vmatprep.subr.bf16.mxu0 %v1396_v5  ;;  %1290 = vmatprep.subr.bf16.mxu1 %v1396_v5 }
  0x20   : > { %1221 = vmatmul.mubr.msk.f32.vlgmr.msra.gmra.mrb[0].mxu0 %vm424_vm1, %v410_v16  ;;  %1235 = vmatmul.mubr.msk.f32.vlgmr.msra.gmra.mrb[0].mxu1 %vm424_vm1, %v530_v17 }
  0x21   : > { %1286 = vmatpush3.bf16.msra.mxu0 %v1501_v10  ;;  %1292 = vmatpush3.bf16.msra.mxu1 %v1501_v10 }
  0x22   : > { %1287 = vmatprep.subr.bf16.mxu0 %v1396_v5  ;;  %1293 = vmatprep.subr.bf16.mxu1 %v1396_v5 }
  0x23   : > { %1256 = vmatprep.mubr.msk.f32.mxu1 %vm1397_vm2, %v1398_v13  ;;  %1223 = vmatprep.mubr.msk.f32.mxu0 %vm424_vm1, %v411_v37 }
  0x24   : > { %1224 = vmatmul.mubr.msk.f32.gmra.mrb[2].mxu0 %vm424_vm1, %v412_v38 }
  0x25   : > { %1289 = vmatpush3.bf16.msra.mxu0 %v1514_v15  ;;  %1295 = vmatpush3.bf16.msra.mxu1 %v1514_v15 }
  0x26   : > { %1296 = vmatprep.subr.bf16.mxu0 %v1396_v5  ;;  %1245 = vmatprep.mubr.msk.f32.mxu0 %vm1397_vm2, %v1398_v13 }
  0xf3   : > { %v1222_v19 = vpop.f32.mrb[0].mxu0  ;;  %v601_v20 = vpop.f32.mrb[0].mxu1 }
  0xf4   : > { %v503_v21 = vpop.f32.mrb[1].mxu0  ;;  %v1236_v22 = vpop.f32.mrb[1].mxu1  ;;  %v509_v23 = vadd.f32 %v1222_v19, %v1535_v18 }
  0xf5   : > { %v504_v24 = vadd.f32 %v1535_v18, %v503_v21 }
  0xf6   : > { %v1169_v27 = vmul.f32 -1.442695, %v509_v23 }
  0xf7   : > { %v1166_v25 = vmul.f32 -1.442695, %v504_v24  ;;  %v605_v26 = vadd.f32 %v601_v20, %v504_v24  ;;  %v1225_v46 = vpop.f32.mrb[2].mxu0 }
  0xf8   : > { %v513_v47 = vpop.f32.mrb[3].mxu0  ;;  %v519_v3 = vadd.f32 %v1225_v46, %v1535_v18 }
  0xf9   : > { %1332 = vpow2.f32 %v1166_v25  ;;  %v1165_v34 = vmul.f32 -1.442695, %v605_v26  ;;  %v514_v49 = vadd.f32 %v1535_v18, %v513_v47 }
  0xfa   : > { %1334 = vpow2.f32 %v1169_v27  ;;  %v1177_v7 = vmul.f32 -1.442695, %v519_v3 }
  0xfb   : > { %v1173_v53 = vmul.f32 -1.442695, %v514_v49 }
 0x103   : > { %v1333_v28 = vpop.eup %1332 }
 0x104   : > { %v615_v29 = vadd.f32 1.0, %v1333_v28  ;;  %v1335_v30 = vpop.eup %1334 }
 0x105   : > { %v729_v31 = vadd.f32 1.0, %v1335_v30 }
 0x106   : > { %1336 = vrcp.f32 %v615_v29 }
 0x107   : > { %1338 = vrcp.f32 %v729_v31 }
 0x108   : > { %1340 = vpow2.f32 %v1165_v34 }
 0x110   : > { %v1337_v32 = vpop.eup %1336 }
 0x111   : > { %623 = vrot.lane.b32.xlu0 %v1337_v32, %s1399_s19  ;;  %v1339_v33 = vpop.eup %1338 }
 0x112   : > { %v1341_v35 = vpop.eup %1340 }
 0x113   : > { %v609_v36 = vadd.f32 1.0, %v1341_v35 }
 0x115   : > { %618 = vrot.lane.b32.xlu0 %v530_v17, %s1399_s19  ;;  %1342 = vrcp.f32 %v609_v36 }
 0x119   : > { %734 = vrot.lane.b32.xlu0 %v1339_v33, %s1399_s19 }
 0x11f   : > { %v1548_v39 = vpop.eup %1342 }
 0x183   : > { %v624_v40 = vpop.permute.xlu0 %623 }
 0x184   : > { %v626_v41 = vmul.f32 %v1548_v39, %v624_v40 }
 0x186   : > { %628 = vrot.lane.b32.xlu1 %v626_v41, %s1399_s19 }
 0x187   : > { %v619_v42 = vpop.permute.xlu0 %618 }
 0x188   : > { %v621_v43 = vmul.f32 %v1548_v39, %v619_v42 }
 0x18b   : > { %v735_v60 = vpop.permute.xlu0 %734 }
 0x1f8   : > { %v629_v44 = vpop.permute.xlu1 %628 }
 0x1f9   : > { %v631_v45 = vadd.f32 %v629_v44, %v621_v43 }
 0x1fb   : > { %645 = vrot.lane.b32.xlu1 %v631_v45, %s1400_s12 }
 0x26d   : > { %v646_v48 = vpop.permute.xlu1 %645 }
 0x26e   : > { %1246 = vmatmul.mubr.msk.f32.vlgmr.msra.gmra.mrb[4].mxu0 %vm424_vm1, %v646_v48 }
 0x26f   : > { %1298 = vmatpush3.bf16.msra.mxu0 %v1501_v10  ;;  %1267 = vmatprep.mubr.msk.f32.mxu0 %vm1397_vm2, %v1398_v13 }
 0x270   : > { %1299 = vmatprep.subr.bf16.mxu0 %v1396_v5 }
 0x273   : > { %1301 = vmatpush3.bf16.msra.mxu0 %v1514_v15 }
 0x341   : > { %v715_v50 = vpop.f32.mrb[4].mxu0 }
 0x342   : > { %v719_v51 = vadd.f32 %v715_v50, %v509_v23  ;;  %v1247_v52 = vpop.f32.mrb[5].mxu0 }
 0x344   : > { %v1168_v54 = vmul.f32 -1.442695, %v719_v51 }
 0x346   : > { %1344 = vpow2.f32 %v1168_v54 }
 0x347   : > { %1346 = vpow2.f32 %v1173_v53 }
 0x350   : > { %v1345_v55 = vpop.eup %1344 }
 0x351   : > { %v723_v56 = vadd.f32 1.0, %v1345_v55  ;;  %v1347_v57 = vpop.eup %1346 }
 0x352   : > { %v841_v58 = vadd.f32 1.0, %v1347_v57 }
 0x353   : > { %1348 = vrcp.f32 %v723_v56 }
 0x354   : > { %1350 = vrcp.f32 %v841_v58 }
 0x35d   : > { %v1561_v59 = vpop.eup %1348 }
 0x35e   : > { %v737_v61 = vmul.f32 %v1561_v59, %v735_v60  ;;  %v1351_v62 = vpop.eup %1350  ;;  %v732_v63 = vmul.f32 %v1561_v59, %v631_v45 }
 0x360   : > { %739 = vrot.lane.b32.xlu1 %v737_v61, %s1399_s19 }
 0x364   : > { %846 = vrot.lane.b32.xlu1 %v1351_v62, %s1399_s19 }
 0x3d2   : > { %v740_v0 = vpop.permute.xlu1 %739 }
 0x3d3   : > { %v742_v1 = vadd.f32 %v740_v0, %v732_v63 }
 0x3d5   : > { %757 = vrot.lane.b32.xlu0 %v742_v1, %s1400_s12 }
 0x3d6   : > { %v847_v14 = vpop.permute.xlu1 %846 }
 0x447   : > { %v758_v2 = vpop.permute.xlu0 %757 }
 0x448   : > { %1257 = vmatmul.mubr.msk.f32.vlgmr.msra.gmra.mrb[2].mxu1 %vm424_vm1, %v758_v2 }
 0x51b   : > { %v827_v4 = vpop.f32.mrb[2].mxu1 }
 0x51c   : > { %v831_v5 = vadd.f32 %v827_v4, %v514_v49  ;;  %v1258_v6 = vpop.f32.mrb[3].mxu1 }
 0x51e   : > { %v1172_v8 = vmul.f32 -1.442695, %v831_v5 }
 0x520   : > { %1352 = vpow2.f32 %v1172_v8 }
 0x521   : > { %1354 = vpow2.f32 %v1177_v7 }
 0x52a   : > { %v1353_v9 = vpop.eup %1352 }
 0x52b   : > { %v835_v10 = vadd.f32 1.0, %v1353_v9  ;;  %v1355_v11 = vpop.eup %1354 }
 0x52c   : > { %v953_v12 = vadd.f32 1.0, %v1355_v11 }
 0x52d   : > { %1356 = vrcp.f32 %v835_v10 }
 0x52e   : > { %1358 = vrcp.f32 %v953_v12 }
 0x537   : > { %v1357_v13 = vpop.eup %1356 }
 0x538   : > { %v849_v15 = vmul.f32 %v1357_v13, %v847_v14  ;;  %v1359_v16 = vpop.eup %1358  ;;  %v844_v17 = vmul.f32 %v1357_v13, %v742_v1 }
 0x53a   : > { %851 = vrot.lane.b32.xlu0 %v849_v15, %s1399_s19 }
 0x53e   : > { %958 = vrot.lane.b32.xlu0 %v1359_v16, %s1399_s19 }
 0x542   : > { %633 = vrot.lane.b32.xlu0 %v631_v45, %s1399_s19 }
 0x5ac   : > { %v852_v18 = vpop.permute.xlu0 %851 }
 0x5ad   : > { %v854_v19 = vadd.f32 %v852_v18, %v844_v17 }
 0x5af   : > { %856 = vrot.lane.b32.xlu0 %v854_v19, %s1399_s19  ;;  %869 = vrot.lane.b32.xlu1 %v854_v19, %s1400_s12 }
 0x5b0   : > { %v959_v20 = vpop.permute.xlu0 %958 }
 0x5b4   : > { %v634_v21 = vpop.permute.xlu0 %633 }
 0x5b5   : > { %v636_v22 = vmul.f32 %v1548_v39, %v634_v21 }
 0x5b7   : > { %1360 = vtanh.f32 %v636_v22 }
 0x5c1   : > { %v1361_v23 = vpop.eup %1360 }
 0x5c2   : > { %639 = vrot.lane.b32.xlu0 %v1361_v23, %s1401_s20 }
 0x621   : > { %v857_v24 = vpop.permute.xlu0 %856  ;;  %v870_v25 = vpop.permute.xlu1 %869 }
 0x622   : > { %v859_v26 = vmul.f32 %v1357_v13, %v857_v24  ;;  %1268 = vmatmul.mubr.msk.f32.vlgmr.msra.gmra.mrb[6].mxu0 %vm424_vm1, %v870_v25 }
 0x624   : > { %1362 = vtanh.f32 %v859_v26 }
 0x62e   : > { %v1363_v27 = vpop.eup %1362 }
 0x62f   : > { %862 = vrot.lane.b32.xlu0 %v1363_v27, %s1401_s20 }
 0x634   : > { %v640_v28 = vpop.permute.xlu0 %639 }
 0x635   : > { %642 = vst.msk [vmem:[%s1476_s15] sm:$0xff] %vm424_vm1, %v640_v28 }
 0x6a1   : > { %v863_v43 = vpop.permute.xlu0 %862 }
 0x6a2   : > { %1174 = vst.msk [vmem:[%s1476_s15 + $0x10] sm:$0xff] %vm424_vm1, %v863_v43 }
 0x6f5   : > { %v939_v29 = vpop.f32.mrb[6].mxu0 }
 0x6f6   : > { %v943_v30 = vadd.f32 %v939_v29, %v519_v3  ;;  %v1269_v31 = vpop.f32.mrb[7].mxu0 }
 0x6f8   : > { %v1176_v32 = vmul.f32 -1.442695, %v943_v30 }
 0x6fa   : > { %1364 = vpow2.f32 %v1176_v32 }
 0x704   : > { %v1365_v33 = vpop.eup %1364 }
 0x705   : > { %v947_v34 = vadd.f32 1.0, %v1365_v33 }
 0x707   : > { %1366 = vrcp.f32 %v947_v34 }
 0x711   : > { %v1367_v35 = vpop.eup %1366 }
 0x712   : > { %v961_v36 = vmul.f32 %v1367_v35, %v959_v20  ;;  %v956_v37 = vmul.f32 %v1367_v35, %v854_v19 }
 0x714   : > { %963 = vrot.lane.b32.xlu1 %v961_v36, %s1399_s19 }
 0x718   : > { %744 = vrot.lane.b32.xlu1 %v742_v1, %s1399_s19 }
 0x786   : > { %v964_v38 = vpop.permute.xlu1 %963 }
 0x787   : > { %v966_v39 = vadd.f32 %v964_v38, %v956_v37 }
 0x789   : > { %980 = vrot.lane.b32.xlu0 %v966_v39, %s1400_s12  ;;  %968 = vrot.lane.b32.xlu1 %v966_v39, %s1399_s19 }
 0x78a   : > { %v745_v40 = vpop.permute.xlu1 %744 }
 0x78b   : > { %v747_v41 = vmul.f32 %v1561_v59, %v745_v40 }
 0x78d   : > { %1368 = vtanh.f32 %v747_v41 }
 0x797   : > { %v1369_v42 = vpop.eup %1368 }
 0x798   : > { %750 = vrot.lane.b32.xlu1 %v1369_v42, %s1401_s20 }
 0x7fb   : > { %v981_v44 = vpop.permute.xlu0 %980  ;;  %v969_v45 = vpop.permute.xlu1 %968 }
 0x7fc   : > { %983 = vst.msk [vmem:[#allocation4] sm:$0xff] %vm424_vm1, %v981_v44  ;;  %v971_v46 = vmul.f32 %v1367_v35, %v969_v45  ;;  %989 = vst.msk [vmem:[%s1621_s8] sm:$0xff] (!%p1179_p6), %vm424_vm1, %v981_v44 }
 0x7fe   : > { %1370 = vtanh.f32 %v971_v46 }
 0x808   : > { %v1371_v47 = vpop.eup %1370 }
 0x809   : > { %974 = vrot.lane.b32.xlu1 %v1371_v47, %s1401_s20 }
 0x80a   : > { %v751_v48 = vpop.permute.xlu1 %750 }
 0x80b   : > { %1170 = vst.msk [vmem:[%s1476_s15 + $0x8] sm:$0xff] %vm424_vm1, %v751_v48 }
 0x876   : > { %987 = sbr.rel (%p1179_p6) target bundleno = 2173 (0x87d), region = 52 }
 0x87b   : > { %v975_v49 = vpop.permute.xlu1 %974 }
 0x87c   : > { %1178 = vst.msk [vmem:[%s1476_s15 + $0x18] sm:$0xff] %vm424_vm1, %v975_v49  ;;  %988 = vst.msk [vmem:[%s1620_s7] sm:$0xff] (!%p1179_p6), %vm424_vm1, %v975_v49 }
 0x87d PF: > { %s19_s29 = sadd.s32 1, %s1394_s29   ;;  %s1622_s27 = smov %s1390_s28 }
 0x87e   : > { %p16_p7 = scmp.ge.s32.totalorder %s19_s29, 4   ;;  %s1623_s28 = smov %s1625_s4 }
 0x880   :  { %18 = sbr.rel (!%p16_p7) target bundleno = 2 (0x2), region = 118 }

</bundles_post_ra>
